<compile_context>
chip_gen: v6e
topology: v6e:2x2x1
jax: 0.10.0
libtpu: 0.0.40
codegen_flags: <defaults>
</compile_context>

<pallas_src>
import functools

import jax
import jax.numpy as jnp
from jax import lax
from jax.experimental import pallas as pl
from jax.experimental.pallas import tpu as pltpu


# ---------------------------------------------------------------------------
# Init-time weight packing (off the per-step path).
# ---------------------------------------------------------------------------
def pack_weights(weights, compute_dtype=jnp.float32):
    """Stack per-layer PyTorch-layout (H_out, H_in) weights into (L, H_in, H_out).

    The transpose happens once here, so the kernel contracts x's last dim with
    the weight's FIRST dim (plain x @ W) and the MXU RHS is lane-dense.
    Pass compute_dtype=jnp.bfloat16 to halve the weight HBM/VMEM footprint
    (the matmul still accumulates in f32 and the carried activation stays f32).
    # TODO(synk): for bandwidth-bound deployments, add int8 (v5e/v6e) / fp8
    # (v7x) weight packing with per-layer scales applied after the f32 matmul.
    """
    return jnp.stack([w.T for w in weights]).astype(compute_dtype)


# ---------------------------------------------------------------------------
# Fused, gridless kernel: the whole model in one invocation.
# ---------------------------------------------------------------------------
def fused_mlp_kernel(x_ref, w_ref, o_ref):
    """x_ref: (B, H) VMEM, w_ref: (L, H, H) VMEM (pre-transposed), o_ref: (B, H).

    The activation is carried in f32 across layers; only the matmul LHS is cast
    to the weight dtype (no-op for f32 weights, bf16 MXU fast path otherwise).
    """
    num_layers = w_ref.shape[0]
    w_dtype = w_ref.dtype
    act0 = x_ref[...].astype(jnp.float32)

    def layer(l, act):
        # (B, K) @ (K, N) -> (B, N), f32 accumulation on the MXU.
        return lax.dot_general(
            act.astype(w_dtype),
            w_ref[l],
            dimension_numbers=(((1,), (0,)), ((), ())),
            preferred_element_type=jnp.float32,
        )

    # Fully unrolled at trace time (static L) -> full scheduler visibility,
    # weight loads of layer l+1 overlap the matmul of layer l.
    act = lax.fori_loop(0, num_layers, layer, act0, unroll=True)
    o_ref[...] = act.astype(o_ref.dtype)


# ---------------------------------------------------------------------------
# Streaming fallback: one grid step per layer (for weight stacks > VMEM budget).
# ---------------------------------------------------------------------------
def streaming_mlp_kernel(x_ref, w_ref, o_ref, act_ref):
    """x_ref: (B, H_in); w_ref: (H_in, H_out) for this layer (pre-transposed,
    layer dim squeezed); o_ref: (B, H_out); act_ref: f32 (B, H) VMEM scratch
    carried across the whole grid."""
    layer = pl.program_id(0)

    @pl.when(layer == 0)
    def _():
        act_ref[...] = x_ref[...].astype(jnp.float32)

    y = lax.dot_general(
        act_ref[...].astype(w_ref.dtype),
        w_ref[...],
        dimension_numbers=(((1,), (0,)), ((), ())),
        preferred_element_type=jnp.float32,
    )
    # Keep the carried activation in f32 (no cumulative bf16 rounding).
    act_ref[...] = y

    # The output index_map is constant, so this HBM writeback happens once, at
    # grid end.  Do NOT make the out index_map per-iteration: earlier steps
    # would flush uninitialized VMEM.
    @pl.when(layer == pl.num_programs(0) - 1)
    def _():
        o_ref[...] = y.astype(o_ref.dtype)


# Take the fully-fused (gridless) path when the whole weight stack comfortably
# fits VMEM.  Budget kept conservative for v7x's 64 MiB VMEM (weights + x +
# out + headroom for the rest of the program).
_FUSED_WEIGHT_BYTES_LIMIT = 8 * 1024 * 1024


@functools.partial(jax.jit, static_argnames=("force_stream",))
def small_model_forward(x, w_stack, *, force_stream=False):
    """SmallModel.forward: sequentially apply L bias-free Linear layers.

    x       : (B, H) float32
    w_stack : (L, H_in, H_out) pre-transposed weights (f32 or bf16) from pack_weights
    Returns (B, H_out) in x.dtype.
    """
    num_layers, h_in, h_out = w_stack.shape
    assert h_in == h_out, "SmallModel uses square Linear layers"
    batch = x.shape[0]
    w_bytes = w_stack.size * w_stack.dtype.itemsize

    if (w_bytes <= _FUSED_WEIGHT_BYTES_LIMIT) and not force_stream:
        # No grid at all: one kernel invocation, everything VMEM-resident.
        return pl.pallas_call(
            fused_mlp_kernel,
            out_shape=jax.ShapeDtypeStruct((batch, h_out), x.dtype),
            in_specs=[
                pl.BlockSpec(memory_space=pltpu.MemorySpace.VMEM),
                pl.BlockSpec(memory_space=pltpu.MemorySpace.VMEM),
            ],
            out_specs=pl.BlockSpec(memory_space=pltpu.MemorySpace.VMEM),
        )(x, w_stack)

    # Streaming path: weights for one layer per grid step (double-buffered by
    # the pipeline; add pipeline_mode=pl.Buffered(3) on the weight spec if the
    # per-step DMA issue latency ever becomes exposed), f32 activation resident
    # in VMEM across the grid, single HBM writeback at the end.
    # TODO(synk): once a single (H,H) weight block no longer fits the scoped
    # VMEM budget (v7x: 64 MiB physical, v5e: 16 MiB default scoped), tile the
    # K/N axes (grid=(L, N//tn, K//tk), K last+"arbitrary", N "parallel" for
    # v7x's two TensorCores) and/or quantize the weight stream.
    return pl.pallas_call(
        streaming_mlp_kernel,
        out_shape=jax.ShapeDtypeStruct((batch, h_out), x.dtype),
        grid=(num_layers,),
        in_specs=[
            pl.BlockSpec((batch, h_in), lambda l: (0, 0)),
            pl.BlockSpec((None, h_in, h_out), lambda l: (l, 0, 0)),
        ],
        out_specs=pl.BlockSpec((batch, h_out), lambda l: (0, 0)),
        scratch_shapes=[pltpu.VMEM((batch, h_in), jnp.float32)],
        compiler_params=pltpu.CompilerParams(
            # The layer axis carries the activation state -> sequential.
            dimension_semantics=("arbitrary",),
            vmem_limit_bytes=48 * 1024 * 1024,
        ),
    )(x, w_stack)


def init_weights(key, hidden_dim, num_layers):
    """Deterministic PyTorch-like init: U(-1/sqrt(in), 1/sqrt(in)), shape (out, in)."""
    bound = 1.0 / (hidden_dim ** 0.5)
    weights = []
    for _ in range(num_layers):
        key, sub = jax.random.split(key)
        w = jax.random.uniform(
            sub, (hidden_dim, hidden_dim), dtype=jnp.float32,
            minval=-bound, maxval=bound,
        )
        weights.append(w)
    return weights


if __name__ == "__main__":
    hidden_dim = 128   # module default; lane-aligned
    num_layers = 4     # exercise the fused multi-layer path (module default is 1)
    batch = 8

    key = jax.random.PRNGKey(0)
    key, xkey = jax.random.split(key)
    x = jax.random.normal(xkey, (batch, hidden_dim), dtype=jnp.float32)
    torch_weights = init_weights(key, hidden_dim, num_layers)  # PyTorch (out, in) layout

    def ref_forward(x, ws):
        out = x
        for w in ws:
            out = out @ w.T
        return out

    ref = ref_forward(x, torch_weights)

    # --- fused gridless path, f32 weights (tight tolerance) ---
    w_f32 = pack_weights(torch_weights, jnp.float32)
    out_f32 = jax.block_until_ready(small_model_forward(x, w_f32))
    assert jnp.allclose(out_f32, ref, atol=1e-4, rtol=1e-4), "f32 mismatch vs reference"

    # --- single-layer case (the module's default num_layers=1), same kernel ---
    out_l1 = jax.block_until_ready(small_model_forward(x, pack_weights(torch_weights[:1])))
    ref_l1 = x @ torch_weights[0].T
    assert jnp.allclose(out_l1, ref_l1, atol=1e-4, rtol=1e-4), "L=1 mismatch vs reference"

    # --- bf16 weight stream (f32 carried activation + f32 MXU accumulation) ---
    w_bf16 = pack_weights(torch_weights, jnp.bfloat16)
    out_bf16 = jax.block_until_ready(small_model_forward(x, w_bf16))
    assert jnp.allclose(out_bf16, ref, atol=1e-2, rtol=5e-2), "bf16 mismatch vs reference"

    # --- streaming (per-layer grid) fallback, forced at small shape to validate ---
    out_stream = jax.block_until_ready(small_model_forward(x, w_f32, force_stream=True))
    assert jnp.allclose(out_stream, ref, atol=1e-4, rtol=1e-4), "streaming mismatch vs reference"

    print("KERNEL_OK")
</pallas_src>

<mosaic_0001>
module attributes {stable_mosaic.version = 11 : i64} {
  func.func @fused_mlp_kernel(%arg0: memref<8x128xf32, #tpu.memory_space<vmem>>, %arg1: memref<4x128x128xf32, #tpu.memory_space<vmem>>, %arg2: memref<8x128xf32, #tpu.memory_space<vmem>>) attributes {dimension_semantics = [], scalar_prefetch = 0 : i64, scratch_operands = 0 : i64, tpu.core_type = #tpu.core_type<tc>} {
    %c0 = arith.constant 0 : index
    %c0_0 = arith.constant 0 : index
    %0 = vector.load %arg0[%c0, %c0_0] : memref<8x128xf32, #tpu.memory_space<vmem>>, vector<8x128xf32>
    %c0_i32 = arith.constant 0 : i32
    %1 = arith.index_cast %c0_i32 : i32 to index
    %c0_1 = arith.constant 0 : index
    %c0_2 = arith.constant 0 : index
    %2 = vector.load %arg1[%1, %c0_1, %c0_2] : memref<4x128x128xf32, #tpu.memory_space<vmem>>, vector<1x128x128xf32>
    %3 = vector.shape_cast %2 : vector<1x128x128xf32> to vector<128x128xf32>
    %cst = arith.constant dense<0.000000e+00> : vector<8x128xf32>
    %4 = tpu.matmul %0, %3, %cst {dimension_numbers = #tpu.dot_dimension_numbers<[1], [0], [0], [1], [0, 0, 1, 1], [], []>} : vector<8x128xf32>, vector<128x128xf32>, vector<8x128xf32> -> vector<8x128xf32>
    %c1_i32 = arith.constant 1 : i32
    %5 = arith.index_cast %c1_i32 : i32 to index
    %c0_3 = arith.constant 0 : index
    %c0_4 = arith.constant 0 : index
    %6 = vector.load %arg1[%5, %c0_3, %c0_4] : memref<4x128x128xf32, #tpu.memory_space<vmem>>, vector<1x128x128xf32>
    %7 = vector.shape_cast %6 : vector<1x128x128xf32> to vector<128x128xf32>
    %cst_5 = arith.constant dense<0.000000e+00> : vector<8x128xf32>
    %8 = tpu.matmul %4, %7, %cst_5 {dimension_numbers = #tpu.dot_dimension_numbers<[1], [0], [0], [1], [0, 0, 1, 1], [], []>} : vector<8x128xf32>, vector<128x128xf32>, vector<8x128xf32> -> vector<8x128xf32>
    %c2_i32 = arith.constant 2 : i32
    %9 = arith.index_cast %c2_i32 : i32 to index
    %c0_6 = arith.constant 0 : index
    %c0_7 = arith.constant 0 : index
    %10 = vector.load %arg1[%9, %c0_6, %c0_7] : memref<4x128x128xf32, #tpu.memory_space<vmem>>, vector<1x128x128xf32>
    %11 = vector.shape_cast %10 : vector<1x128x128xf32> to vector<128x128xf32>
    %cst_8 = arith.constant dense<0.000000e+00> : vector<8x128xf32>
    %12 = tpu.matmul %8, %11, %cst_8 {dimension_numbers = #tpu.dot_dimension_numbers<[1], [0], [0], [1], [0, 0, 1, 1], [], []>} : vector<8x128xf32>, vector<128x128xf32>, vector<8x128xf32> -> vector<8x128xf32>
    %c3_i32 = arith.constant 3 : i32
    %13 = arith.index_cast %c3_i32 : i32 to index
    %c0_9 = arith.constant 0 : index
    %c0_10 = arith.constant 0 : index
    %14 = vector.load %arg1[%13, %c0_9, %c0_10] : memref<4x128x128xf32, #tpu.memory_space<vmem>>, vector<1x128x128xf32>
    %15 = vector.shape_cast %14 : vector<1x128x128xf32> to vector<128x128xf32>
    %cst_11 = arith.constant dense<0.000000e+00> : vector<8x128xf32>
    %16 = tpu.matmul %12, %15, %cst_11 {dimension_numbers = #tpu.dot_dimension_numbers<[1], [0], [0], [1], [0, 0, 1, 1], [], []>} : vector<8x128xf32>, vector<128x128xf32>, vector<8x128xf32> -> vector<8x128xf32>
    %c4_i32 = arith.constant 4 : i32
    %c0_12 = arith.constant 0 : index
    %c0_13 = arith.constant 0 : index
    %17 = vector.load %arg2[%c0_12, %c0_13] : memref<8x128xf32, #tpu.memory_space<vmem>>, vector<8x128xf32>
    tpu.vector_store %arg2[%c0_12, %c0_13], %16 {strides = array<i32>} : memref<8x128xf32, #tpu.memory_space<vmem>>, vector<8x128xf32>,
    return
  }
}

</mosaic_0001>

<bundles_post_ra>
// kernel: small_model_forward.1
= control target key start
LH: loop header
LB: loop body
LE: loop exit
PB: predicated region body
PF: predicated region fallthrough
CT: control target
= control target key end

     0   :  { %7 = vsyncpa [#allocation3], 0  ;;  %s787_s0 = inlined_call_operand.hbm [shape: f32[8,128], index: 0, kind: input, shape index: {}]   ;;  %s788_s1 = inlined_call_operand.hbm [shape: f32[4,128,128], index: 1, kind: input, shape index: {}]   ;;  %s789_s2 = inlined_call_operand.hbm [shape: f32[8,128], index: 2, kind: output, shape index: {}]  }
   0x1   :  { %8 = vsyncpa [#allocation6], 0 }
   0x2   :  { %9 = vsyncpa [#allocation4], 0  ;;  %s684_s9 = smov [#allocation2]   ;;  %s685_s11 = smov [#allocation5]  }
   0x3   :  { %s16_s10 = sshll.u32 %s684_s9, 4  ;;  %s25_s12 = sshll.u32 %s685_s11, 4  ;;  %s17_s10 = int_to_ptr.vmem [resolvable:$true] %s16_s10  ;;  %s26_s12 = int_to_ptr.vmem [resolvable:$true] %s25_s12 }
   0x4   :  { %s626_s13 = scalar_lea.vmem %s17_s10, 128  ;;  %p631_p1 = scmp.lt.s32.totalorder %s17_s10, %s17_s10 }
   0x5   :  { %p627_p0 = scmp.ne.s32.totalorder %s17_s10, %s626_s13  ;;  %p632_p2 = scmp.lt.s32.totalorder %s626_s13, %s626_s13 }
   0x7   :  { %p633_p3 = por %p632_p2, %p631_p1 }
   0x9   :  { %p634_p4 = pnand %p633_p3, %p627_p0 }
   0xb   :  { %637 = shalt.err (!%p634_p4)
}
   0xc   :  { %19 = dma.hbm_to_vmem [thread:$0]  %s787_s0, 128, %s17_s10, [#allocation3]  }
   0xd   :  { %s646_s16 = scalar_lea.vmem %s26_s12, 8192  ;;  %p651_p6 = scmp.lt.s32.totalorder %s26_s12, %s26_s12 }
   0xe   :  { %p647_p5 = scmp.ne.s32.totalorder %s26_s12, %s646_s16  ;;  %p652_p7 = scmp.lt.s32.totalorder %s646_s16, %s646_s16 }
  0x10   :  { %p653_p8 = por %p652_p7, %p651_p6 }
  0x12   :  { %p654_p9 = pnand %p653_p8, %p647_p5 }
  0x14   :  { %657 = shalt.err (!%p654_p9)
}
  0x15   :  { %s686_s17 = smov 128   ;;  %s687_s18 = smov 8  }
  0x16   :  { %31 = dma.hbm_to_vmem [thread:$0]  %s788_s1, 8192, %s26_s12, [#allocation6], %s686_s17, %s686_s17, %s687_s18  }
  0x17   :  { %678 = dma.done.wait [#allocation3], 128  }
  0x18   :  { %679 = vsyncadd [#allocation3], 4294967168 }
  0x19   :  { %680 = dma.done.wait [#allocation6], 8192  }
  0x1a   :  { %681 = vsyncadd [#allocation6], 4294959104  ;;  %v688_v0 = vmov 0.0   ;;  %vm689_vm0 = vmmov 0   ;;  %v54_v1 = vld [vmem:[#allocation5 + $0x78] sm:$0xff]  ;;  %v53_v2 = vld [vmem:[#allocation5 + $0x70] sm:$0xff] }
  0x1b   :  { %471 = vmatprep.subr.mxu0 %v688_v0  ;;  %503 = vmatprep.mubr.msk.f32.mxu0 %vm689_vm0, %v688_v0  ;;  %v52_v3 = vld [vmem:[#allocation5 + $0x68] sm:$0xff]  ;;  %v51_v4 = vld [vmem:[#allocation5 + $0x60] sm:$0xff]  ;;  %v141_v5 = vld [vmem:[#allocation5 + $0xf8] sm:$0xff]  ;;  %s690_s0 = smov [#allocation7]  }
  0x1c   :  { %506 = vmatprep.subr.mxu1 %v688_v0  ;;  %538 = vmatprep.mubr.msk.f32.mxu1 %vm689_vm0, %v688_v0  ;;  %v50_v6 = vld [vmem:[#allocation5 + $0x58] sm:$0xff]  ;;  %v140_v7 = vld [vmem:[#allocation5 + $0xf0] sm:$0xff]  ;;  %v139_v8 = vld [vmem:[#allocation5 + $0xe8] sm:$0xff]  ;;  %s393_s1 = sshll.u32 %s690_s0, 4  ;;  %s394_s1 = int_to_ptr.vmem [resolvable:$true] %s393_s1 }
  0x1d   :  { %472 = vmatpush3.msra.mxu0 %v54_v1  ;;  %507 = vmatpush3.msra.mxu1 %v141_v5  ;;  %v49_v9 = vld [vmem:[#allocation5 + $0x50] sm:$0xff]  ;;  %v138_v10 = vld [vmem:[#allocation5 + $0xe0] sm:$0xff]  ;;  %v48_v11 = vld [vmem:[#allocation5 + $0x48] sm:$0xff]  ;;  %s658_s21 = scalar_lea.vmem %s394_s1, 128  ;;  %p663_p11 = scmp.lt.s32.totalorder %s394_s1, %s394_s1 }
  0x1e   :  { %473 = vmatprep.subr.mxu0 %v688_v0  ;;  %508 = vmatprep.subr.mxu1 %v688_v0  ;;  %v137_v12 = vld [vmem:[#allocation5 + $0xd8] sm:$0xff]  ;;  %v47_v13 = vld [vmem:[#allocation5 + $0x40] sm:$0xff]  ;;  %v136_v14 = vld [vmem:[#allocation5 + $0xd0] sm:$0xff]  ;;  %p659_p10 = scmp.ne.s32.totalorder %s394_s1, %s658_s21  ;;  %p664_p12 = scmp.lt.s32.totalorder %s658_s21, %s658_s21 }
  0x1f   :  { %474 = vmatpush3.msra.mxu0 %v53_v2  ;;  %509 = vmatpush3.msra.mxu1 %v140_v7  ;;  %v46_v15 = vld [vmem:[#allocation5 + $0x38] sm:$0xff]  ;;  %v135_v16 = vld [vmem:[#allocation5 + $0xc8] sm:$0xff]  ;;  %v45_v17 = vld [vmem:[#allocation5 + $0x30] sm:$0xff] }
  0x20   :  { %475 = vmatprep.subr.mxu0 %v688_v0  ;;  %510 = vmatprep.subr.mxu1 %v688_v0  ;;  %v134_v18 = vld [vmem:[#allocation5 + $0xc0] sm:$0xff]  ;;  %v44_v19 = vld [vmem:[#allocation5 + $0x28] sm:$0xff]  ;;  %v133_v20 = vld [vmem:[#allocation5 + $0xb8] sm:$0xff]  ;;  %p665_p13 = por %p664_p12, %p663_p11 }
  0x21   :  { %476 = vmatpush3.msra.mxu0 %v52_v3  ;;  %511 = vmatpush3.msra.mxu1 %v139_v8  ;;  %v43_v21 = vld [vmem:[#allocation5 + $0x20] sm:$0xff]  ;;  %v132_v22 = vld [vmem:[#allocation5 + $0xb0] sm:$0xff]  ;;  %v42_v23 = vld [vmem:[#allocation5 + $0x18] sm:$0xff] }
  0x22   :  { %477 = vmatprep.subr.mxu0 %v688_v0  ;;  %512 = vmatprep.subr.mxu1 %v688_v0  ;;  %v131_v24 = vld [vmem:[#allocation5 + $0xa8] sm:$0xff]  ;;  %v41_v25 = vld [vmem:[#allocation5 + $0x10] sm:$0xff]  ;;  %v130_v26 = vld [vmem:[#allocation5 + $0xa0] sm:$0xff]  ;;  %p666_p0 = pnand %p665_p13, %p659_p10 }
  0x23   :  { %478 = vmatpush3.msra.mxu0 %v51_v4  ;;  %513 = vmatpush3.msra.mxu1 %v138_v10  ;;  %v40_v27 = vld [vmem:[#allocation5 + $0x8] sm:$0xff]  ;;  %v129_v28 = vld [vmem:[#allocation5 + $0x98] sm:$0xff]  ;;  %v39_v29 = vld [vmem:[#allocation5] sm:$0xff] }
  0x24   :  { %479 = vmatprep.subr.mxu0 %v688_v0  ;;  %514 = vmatprep.subr.mxu1 %v688_v0  ;;  %v38_v30 = vld [vmem:[#allocation2] sm:$0xff]  ;;  %v128_v31 = vld [vmem:[#allocation5 + $0x90] sm:$0xff]  ;;  %v127_v32 = vld [vmem:[#allocation5 + $0x88] sm:$0xff] }
  0x25   :  { %480 = vmatpush3.msra.mxu0 %v50_v6  ;;  %515 = vmatpush3.msra.mxu1 %v137_v12  ;;  %v126_v33 = vld [vmem:[#allocation5 + $0x80] sm:$0xff]  ;;  %v228_v34 = vld [vmem:[#allocation5 + $0x178] sm:$0xff]  ;;  %v227_v35 = vld [vmem:[#allocation5 + $0x170] sm:$0xff] }
  0x26   :  { %481 = vmatprep.subr.mxu0 %v688_v0  ;;  %516 = vmatprep.subr.mxu1 %v688_v0  ;;  %v226_v36 = vld [vmem:[#allocation5 + $0x168] sm:$0xff]  ;;  %v225_v37 = vld [vmem:[#allocation5 + $0x160] sm:$0xff]  ;;  %v224_v38 = vld [vmem:[#allocation5 + $0x158] sm:$0xff] }
  0x27   :  { %482 = vmatpush3.msra.mxu0 %v49_v9  ;;  %517 = vmatpush3.msra.mxu1 %v136_v14  ;;  %v223_v39 = vld [vmem:[#allocation5 + $0x150] sm:$0xff]  ;;  %v222_v40 = vld [vmem:[#allocation5 + $0x148] sm:$0xff]  ;;  %v221_v41 = vld [vmem:[#allocation5 + $0x140] sm:$0xff] }
  0x28   :  { %483 = vmatprep.subr.mxu0 %v688_v0  ;;  %518 = vmatprep.subr.mxu1 %v688_v0  ;;  %v220_v42 = vld [vmem:[#allocation5 + $0x138] sm:$0xff]  ;;  %v219_v43 = vld [vmem:[#allocation5 + $0x130] sm:$0xff]  ;;  %v218_v44 = vld [vmem:[#allocation5 + $0x128] sm:$0xff] }
  0x29   :  { %484 = vmatpush3.msra.mxu0 %v48_v11  ;;  %519 = vmatpush3.msra.mxu1 %v135_v16  ;;  %v217_v45 = vld [vmem:[#allocation5 + $0x120] sm:$0xff]  ;;  %v216_v46 = vld [vmem:[#allocation5 + $0x118] sm:$0xff]  ;;  %v215_v47 = vld [vmem:[#allocation5 + $0x110] sm:$0xff] }
  0x2a   :  { %485 = vmatprep.subr.mxu0 %v688_v0  ;;  %520 = vmatprep.subr.mxu1 %v688_v0  ;;  %v214_v48 = vld [vmem:[#allocation5 + $0x108] sm:$0xff]  ;;  %v213_v51 = vld [vmem:[#allocation5 + $0x100] sm:$0xff]  ;;  %v315_v52 = vld [vmem:[#allocation5 + $0x1f8] sm:$0xff] }
  0x2b   :  { %486 = vmatpush3.msra.mxu0 %v47_v13  ;;  %521 = vmatpush3.msra.mxu1 %v134_v18  ;;  %v314_v53 = vld [vmem:[#allocation5 + $0x1f0] sm:$0xff]  ;;  %v313_v54 = vld [vmem:[#allocation5 + $0x1e8] sm:$0xff]  ;;  %v312_v55 = vld [vmem:[#allocation5 + $0x1e0] sm:$0xff] }
  0x2c   :  { %487 = vmatprep.subr.mxu0 %v688_v0  ;;  %522 = vmatprep.subr.mxu1 %v688_v0  ;;  %v311_v56 = vld [vmem:[#allocation5 + $0x1d8] sm:$0xff]  ;;  %v310_v57 = vld [vmem:[#allocation5 + $0x1d0] sm:$0xff]  ;;  %v309_v58 = vld [vmem:[#allocation5 + $0x1c8] sm:$0xff] }
  0x2d   :  { %488 = vmatpush3.msra.mxu0 %v46_v15  ;;  %523 = vmatpush3.msra.mxu1 %v133_v20  ;;  %v308_v59 = vld [vmem:[#allocation5 + $0x1c0] sm:$0xff]  ;;  %v307_v60 = vld [vmem:[#allocation5 + $0x1b8] sm:$0xff]  ;;  %v306_v61 = vld [vmem:[#allocation5 + $0x1b0] sm:$0xff] }
  0x2e   :  { %489 = vmatprep.subr.mxu0 %v688_v0  ;;  %524 = vmatprep.subr.mxu1 %v688_v0  ;;  %v305_v62 = vld [vmem:[#allocation5 + $0x1a8] sm:$0xff]  ;;  %v304_v63 = vld [vmem:[#allocation5 + $0x1a0] sm:$0xff]  ;;  %v303_v1 = vld [vmem:[#allocation5 + $0x198] sm:$0xff] }
  0x2f   :  { %490 = vmatpush3.msra.mxu0 %v45_v17  ;;  %525 = vmatpush3.msra.mxu1 %v132_v22  ;;  %v302_v2 = vld [vmem:[#allocation5 + $0x190] sm:$0xff]  ;;  %v301_v3 = vld [vmem:[#allocation5 + $0x188] sm:$0xff]  ;;  %v300_v6 = vld [vmem:[#allocation5 + $0x180] sm:$0xff] }
  0x30   :  { %491 = vmatprep.subr.mxu0 %v688_v0  ;;  %526 = vmatprep.subr.mxu1 %v688_v0 }
  0x31   :  { %492 = vmatpush3.msra.mxu0 %v44_v19  ;;  %527 = vmatpush3.msra.mxu1 %v131_v24 }
  0x32   :  { %493 = vmatprep.subr.mxu0 %v688_v0  ;;  %528 = vmatprep.subr.mxu1 %v688_v0 }
  0x33   :  { %494 = vmatpush3.msra.mxu0 %v43_v21  ;;  %529 = vmatpush3.msra.mxu1 %v130_v26 }
  0x34   :  { %495 = vmatprep.subr.mxu0 %v688_v0  ;;  %530 = vmatprep.subr.mxu1 %v688_v0 }
  0x35   :  { %496 = vmatpush3.msra.mxu0 %v42_v23  ;;  %531 = vmatpush3.msra.mxu1 %v129_v28 }
  0x36   :  { %497 = vmatprep.subr.mxu0 %v688_v0  ;;  %532 = vmatprep.subr.mxu1 %v688_v0 }
  0x37   :  { %498 = vmatpush3.msra.mxu0 %v41_v25  ;;  %533 = vmatpush3.msra.mxu1 %v128_v31 }
  0x38   :  { %499 = vmatprep.subr.mxu0 %v688_v0  ;;  %534 = vmatprep.subr.mxu1 %v688_v0 }
  0x39   :  { %500 = vmatpush3.msra.mxu0 %v40_v27  ;;  %535 = vmatpush3.msra.mxu1 %v127_v32 }
  0x3a   :  { %501 = vmatprep.subr.mxu0 %v688_v0  ;;  %536 = vmatprep.subr.mxu1 %v688_v0 }
  0x3b   :  { %502 = vmatpush3.msra.mxu0 %v39_v29  ;;  %537 = vmatpush3.msra.mxu1 %v126_v33 }
  0x3c   :  { %504 = vmatmul.mubr.f32.vlgmr.msra.gmra.mxu0 %v38_v30  ;;  %541 = vmatprep.subr.mxu0 %v688_v0 }
  0x3d   :  { %573 = vmatprep.mubr.msk.f32.mxu0 %vm689_vm0, %v688_v0  ;;  %576 = vmatprep.subr.mxu1 %v688_v0 }
  0x3e   :  { %542 = vmatpush3.msra.mxu0 %v228_v34 }
  0x3f   :  { %543 = vmatprep.subr.mxu0 %v688_v0 }
  0x40   :  { %544 = vmatpush3.msra.mxu0 %v227_v35 }
  0x41   :  { %545 = vmatprep.subr.mxu0 %v688_v0 }
  0x42   :  { %546 = vmatpush3.msra.mxu0 %v226_v36 }
  0x43   :  { %547 = vmatprep.subr.mxu0 %v688_v0 }
  0x44   :  { %548 = vmatpush3.msra.mxu0 %v225_v37 }
  0x45   :  { %549 = vmatprep.subr.mxu0 %v688_v0 }
  0x46   :  { %550 = vmatpush3.msra.mxu0 %v224_v38 }
  0x47   :  { %551 = vmatprep.subr.mxu0 %v688_v0 }
  0x48   :  { %552 = vmatpush3.msra.mxu0 %v223_v39 }
  0x49   :  { %553 = vmatprep.subr.mxu0 %v688_v0 }
  0x4a   :  { %554 = vmatpush3.msra.mxu0 %v222_v40 }
  0x4b   :  { %555 = vmatprep.subr.mxu0 %v688_v0 }
  0x4c   :  { %556 = vmatpush3.msra.mxu0 %v221_v41 }
  0x4d   :  { %557 = vmatprep.subr.mxu0 %v688_v0 }
  0x4e   :  { %558 = vmatpush3.msra.mxu0 %v220_v42 }
  0x4f   :  { %559 = vmatprep.subr.mxu0 %v688_v0 }
  0x50   :  { %560 = vmatpush3.msra.mxu0 %v219_v43 }
  0x51   :  { %561 = vmatprep.subr.mxu0 %v688_v0 }
  0x52   :  { %562 = vmatpush3.msra.mxu0 %v218_v44 }
  0x53   :  { %563 = vmatprep.subr.mxu0 %v688_v0 }
  0x54   :  { %564 = vmatpush3.msra.mxu0 %v217_v45 }
  0x55   :  { %565 = vmatprep.subr.mxu0 %v688_v0 }
  0x56   :  { %566 = vmatpush3.msra.mxu0 %v216_v46 }
  0x57   :  { %567 = vmatprep.subr.mxu0 %v688_v0 }
  0x58   :  { %568 = vmatpush3.msra.mxu0 %v215_v47 }
  0x59   :  { %569 = vmatprep.subr.mxu0 %v688_v0 }
  0x5a   :  { %570 = vmatpush3.msra.mxu0 %v214_v48 }
  0x5b   :  { %571 = vmatprep.subr.mxu0 %v688_v0 }
  0x5c   :  { %572 = vmatpush3.msra.mxu0 %v213_v51 }
  0xfc   :  { %v121_v49 = vpop.f32.mrf.mxu0 }
  0xfd   :  { %539 = vmatmul.mubr.f32.vlgmr.msra.gmra.mxu1 %v121_v49 }
  0xfe   :  { %v505_v50 = vpop.f32.mrf.mxu0  ;;  %608 = vmatprep.mubr.msk.f32.mxu1 %vm689_vm0, %v688_v0  ;;  %577 = vmatpush3.msra.mxu1 %v315_v52 }
  0xff   :  { %578 = vmatprep.subr.mxu1 %v688_v0 }
 0x100   :  { %579 = vmatpush3.msra.mxu1 %v314_v53 }
 0x101   :  { %580 = vmatprep.subr.mxu1 %v688_v0 }
 0x102   :  { %581 = vmatpush3.msra.mxu1 %v313_v54 }
 0x103   :  { %582 = vmatprep.subr.mxu1 %v688_v0 }
 0x104   :  { %583 = vmatpush3.msra.mxu1 %v312_v55 }
 0x105   :  { %584 = vmatprep.subr.mxu1 %v688_v0 }
 0x106   :  { %585 = vmatpush3.msra.mxu1 %v311_v56 }
 0x107   :  { %586 = vmatprep.subr.mxu1 %v688_v0 }
 0x108   :  { %587 = vmatpush3.msra.mxu1 %v310_v57 }
 0x109   :  { %588 = vmatprep.subr.mxu1 %v688_v0 }
 0x10a   :  { %589 = vmatpush3.msra.mxu1 %v309_v58 }
 0x10b   :  { %590 = vmatprep.subr.mxu1 %v688_v0 }
 0x10c   :  { %591 = vmatpush3.msra.mxu1 %v308_v59 }
 0x10d   :  { %592 = vmatprep.subr.mxu1 %v688_v0 }
 0x10e   :  { %593 = vmatpush3.msra.mxu1 %v307_v60 }
 0x10f   :  { %594 = vmatprep.subr.mxu1 %v688_v0 }
 0x110   :  { %595 = vmatpush3.msra.mxu1 %v306_v61 }
 0x111   :  { %596 = vmatprep.subr.mxu1 %v688_v0 }
 0x112   :  { %597 = vmatpush3.msra.mxu1 %v305_v62 }
 0x113   :  { %598 = vmatprep.subr.mxu1 %v688_v0 }
 0x114   :  { %599 = vmatpush3.msra.mxu1 %v304_v63 }
 0x115   :  { %600 = vmatprep.subr.mxu1 %v688_v0 }
 0x116   :  { %601 = vmatpush3.msra.mxu1 %v303_v1 }
 0x117   :  { %602 = vmatprep.subr.mxu1 %v688_v0 }
 0x118   :  { %603 = vmatpush3.msra.mxu1 %v302_v2 }
 0x119   :  { %604 = vmatprep.subr.mxu1 %v688_v0 }
 0x11a   :  { %605 = vmatpush3.msra.mxu1 %v301_v3 }
 0x11b   :  { %606 = vmatprep.subr.mxu1 %v688_v0 }
 0x11c   :  { %607 = vmatpush3.msra.mxu1 %v300_v6 }
 0x1bd   :  { %v208_v4 = vpop.f32.mrf.mxu1 }
 0x1be   :  { %574 = vmatmul.mubr.f32.vlgmr.msra.gmra.mxu0 %v208_v4 }
 0x1bf   :  { %v540_v5 = vpop.f32.mrf.mxu1 }
 0x27e   :  { %v295_v7 = vpop.f32.mrf.mxu0 }
 0x27f   :  { %609 = vmatmul.mubr.f32.vlgmr.msra.gmra.mxu1 %v295_v7 }
 0x280   :  { %v575_v8 = vpop.f32.mrf.mxu0 }
 0x33f   :  { %v382_v9 = vpop.f32.mrf.mxu1 }
 0x340   :  { %386 = vst [vmem:[#allocation7] sm:$0xff] %v382_v9 }
 0x341   :  { %v610_v10 = vpop.f32.mrf.mxu1 }
 0x342   :  { %669 = shalt.err (!%p666_p0)
}
 0x343   :  { %396 = dma.vmem_to_hbm [thread:$0]  %s394_s1, 128, %s789_s2, [#allocation4]  }
 0x344   :  { %682 = dma.done.wait [#allocation4], 128  }
 0x345   :  { %683 = vsyncadd [#allocation4], 4294967168 }
 0x346   :  { %400 = vsyncpa [#allocation3], 1 }
 0x347   :  { %401 = vsyncpa [#allocation6], 1 }
 0x348   :  { %402 = vsyncpa [#allocation4], 1 }

</bundles_post_ra>
